<compile_context>
chip_gen: v7x
topology: tpu7x:2x2x1
jax: 0.10.0
libtpu: 0.0.40
codegen_flags: <defaults>
</compile_context>

<pallas_src>
import math

import jax
import jax.numpy as jnp
from jax.experimental import pallas as pl
from jax.experimental.pallas import tpu as pltpu


# ---------------------------------------------------------------------------
# Kernel 1: FiLM generator MLP — runs once for the whole batch (single block).
#   film = relu(metadata @ w1 + b1) @ w2 + b2 ; gamma, beta = split(film, C)
# ---------------------------------------------------------------------------
def _film_gen_kernel(md_ref, w1_ref, b1_ref, w2_ref, b2_ref, gamma_ref, beta_ref):
    md = md_ref[...].astype(jnp.float32)
    h = jnp.dot(md, w1_ref[...], preferred_element_type=jnp.float32) + b1_ref[...]
    h = jnp.maximum(h, 0.0)
    film = jnp.dot(h, w2_ref[...], preferred_element_type=jnp.float32) + b2_ref[...]
    c = gamma_ref.shape[1]
    gamma_ref[...] = film[:, :c]
    beta_ref[...] = film[:, c:2 * c]


# ---------------------------------------------------------------------------
# Kernel 2: FiLM apply — lane-dense 2-D stream over x viewed as (rows, cols).
#   out[r, :] = gamma[r] * x[r, :] + beta[r]
# ---------------------------------------------------------------------------
def _film_apply_kernel(gamma_ref, beta_ref, x_ref, o_ref):
    g = gamma_ref[...]                       # (tr, 1)  float32
    b = beta_ref[...]                        # (tr, 1)  float32
    o_ref[...] = (g * x_ref[...] + b).astype(o_ref.dtype)


def _round_up(x, m):
    return ((x + m - 1) // m) * m


def film_layer(x, metadata, w1, b1, w2, b2):
    """x: (B, C, H, W), metadata: (B, M). Returns (B, C, H, W)."""
    B, C, H, W = x.shape
    M = metadata.shape[1]
    hidden = w1.shape[1]
    two_c = w2.shape[1]
    HW = H * W
    BC = B * C

    b1_2d = b1.reshape(1, hidden)
    b2_2d = b2.reshape(1, two_c)

    # ---- prologue: FiLM generator (one tiny block, whole batch at once) ----
    gamma_bc, beta_bc = pl.pallas_call(
        _film_gen_kernel,
        out_shape=(
            jax.ShapeDtypeStruct((B, C), jnp.float32),
            jax.ShapeDtypeStruct((B, C), jnp.float32),
        ),
        grid_spec=pltpu.PrefetchScalarGridSpec(
            num_scalar_prefetch=0,
            grid=(1,),
            in_specs=[
                pl.BlockSpec((B, M), lambda i: (0, 0)),
                pl.BlockSpec((M, hidden), lambda i: (0, 0)),
                pl.BlockSpec((1, hidden), lambda i: (0, 0)),
                pl.BlockSpec((hidden, two_c), lambda i: (0, 0)),
                pl.BlockSpec((1, two_c), lambda i: (0, 0)),
            ],
            out_specs=[
                pl.BlockSpec((B, C), lambda i: (0, 0)),
                pl.BlockSpec((B, C), lambda i: (0, 0)),
            ],
        ),
        compiler_params=pltpu.CompilerParams(
            dimension_semantics=("arbitrary",),
        ),
    )(metadata, w1, b1_2d, w2, b2_2d)

    # Per-row columns for the streaming apply kernel (free row-major reshape).
    gamma = gamma_bc.reshape(BC, 1)
    beta = beta_bc.reshape(BC, 1)

    # ---- row folding: restore full (8,128) vreg occupancy when BC % 8 != 0 --
    fold = 1
    if BC % 8 != 0:
        k = 8 // math.gcd(BC, 8)
        if HW % (k * 128) == 0:
            fold = k
    rows = BC * fold
    cols = HW // fold
    x2d = x.reshape(rows, cols)              # rows -> sublanes, cols -> lanes
    if fold > 1:
        gamma = jnp.repeat(gamma, fold, axis=0)
        beta = jnp.repeat(beta, fold, axis=0)

    # ---- tile selection: always (8,128)-aligned; edge blocks are masked -----
    # ~2 MiB f32 per block (256 x 2048) -> ~8 MiB double-buffered in+out,
    # safe under the default scoped-VMEM limit on v5e/v6e/v7x.
    tile_r = min(_round_up(rows, 8), 256)
    tile_c = min(_round_up(cols, 128), 2048)
    grid_r = pl.cdiv(rows, tile_r)
    grid_c = pl.cdiv(cols, tile_c)

    # Guarantee >= 2 blocks so v7x's second TensorCore isn't idle.
    if grid_r * grid_c < 2:
        if cols > 128:
            tile_c = _round_up(pl.cdiv(cols, 2), 128)
        elif rows > 8:
            tile_r = _round_up(pl.cdiv(rows, 2), 8)
        grid_r = pl.cdiv(rows, tile_r)
        grid_c = pl.cdiv(cols, tile_c)

    itemsize = jnp.dtype(x.dtype).itemsize
    cost = pl.CostEstimate(
        flops=2 * rows * cols,
        transcendentals=0,
        bytes_accessed=2 * rows * cols * itemsize + 2 * rows * 4,
    )

    # Grid order: rows OUTER, cols INNER (gamma/beta blocks not re-DMA'd per
    # inner step).  Do not swap.
    out2d = pl.pallas_call(
        _film_apply_kernel,
        out_shape=jax.ShapeDtypeStruct((rows, cols), x.dtype),
        grid_spec=pltpu.PrefetchScalarGridSpec(
            num_scalar_prefetch=0,
            grid=(grid_r, grid_c),
            in_specs=[
                pl.BlockSpec((tile_r, 1), lambda r, c: (r, 0)),        # gamma
                pl.BlockSpec((tile_r, 1), lambda r, c: (r, 0)),        # beta
                pl.BlockSpec((tile_r, tile_c), lambda r, c: (r, c)),   # x
            ],
            out_specs=pl.BlockSpec((tile_r, tile_c), lambda r, c: (r, c)),
        ),
        compiler_params=pltpu.CompilerParams(
            dimension_semantics=("parallel", "parallel"),
        ),
        cost_estimate=cost,
    )(gamma, beta, x2d)

    return out2d.reshape(B, C, H, W)


def film_reference(x, metadata, w1, b1, w2, b2):
    """Pure-JAX reference mirroring the PyTorch forward."""
    h = jnp.maximum(metadata @ w1 + b1, 0.0)
    film = h @ w2 + b2
    C = x.shape[1]
    gamma = film[:, :C].reshape(-1, C, 1, 1)
    beta = film[:, C:2 * C].reshape(-1, C, 1, 1)
    return gamma * x + beta


def _run_case(key, B, C, H, W, metadata_dim=8, hidden=256):
    k_x, k_md, k_w1, k_b1, k_w2, k_b2 = jax.random.split(key, 6)
    x = jax.random.normal(k_x, (B, C, H, W), dtype=jnp.float32)
    metadata = jax.random.normal(k_md, (B, metadata_dim), dtype=jnp.float32)
    w1 = jax.random.normal(k_w1, (metadata_dim, hidden), dtype=jnp.float32) * 0.05
    b1 = jax.random.normal(k_b1, (hidden,), dtype=jnp.float32) * 0.05
    w2 = jax.random.normal(k_w2, (hidden, 2 * C), dtype=jnp.float32) * 0.05
    b2 = jax.random.normal(k_b2, (2 * C,), dtype=jnp.float32) * 0.05

    out = jax.block_until_ready(film_layer(x, metadata, w1, b1, w2, b2))
    ref = film_reference(x, metadata, w1, b1, w2, b2)
    assert out.shape == (B, C, H, W)
    assert jnp.allclose(out, ref, atol=1e-4, rtol=1e-4), (
        f"mismatch vs reference for shape {(B, C, H, W)}"
    )


if __name__ == "__main__":
    key = jax.random.PRNGKey(0)
    k1, k2, k3 = jax.random.split(key, 3)

    # Aligned case: BC=8, HW=256 -> grid split to (1, 2) for megacore.
    _run_case(k1, B=2, C=4, H=16, W=16)
    # Unaligned case: BC=3, HW=200 -> masked edge blocks on both axes.
    _run_case(k2, B=1, C=3, H=10, W=20)
    # Foldable case: BC=2, HW=1024 -> folded to rows=8, cols=256.
    _run_case(k3, B=1, C=2, H=32, W=32)

    print("KERNEL_OK")
</pallas_src>

<mosaic_0001>
module attributes {stable_mosaic.version = 11 : i64} {
  func.func @_film_gen_kernel(%arg0: i32, %arg1: memref<2x8xf32, #tpu.memory_space<vmem>>, %arg2: memref<8x256xf32, #tpu.memory_space<vmem>>, %arg3: memref<1x256xf32, #tpu.memory_space<vmem>>, %arg4: memref<256x8xf32, #tpu.memory_space<vmem>>, %arg5: memref<1x8xf32, #tpu.memory_space<vmem>>, %arg6: memref<2x4xf32, #tpu.memory_space<vmem>>, %arg7: memref<2x4xf32, #tpu.memory_space<vmem>>) attributes {dimension_semantics = [#tpu.dimension_semantics<arbitrary>], iteration_bounds = array<i64: 1>, scalar_prefetch = 0 : i64, scratch_operands = 0 : i64, tpu.core_type = #tpu.core_type<tc>, window_params = [{pipeline_mode = #tpu.pipeline_mode<synchronous>, transform_indices = @transform_0, window_bounds = array<i64: 2, 8>}, {pipeline_mode = #tpu.pipeline_mode<synchronous>, transform_indices = @transform_1, window_bounds = array<i64: 8, 256>}, {pipeline_mode = #tpu.pipeline_mode<synchronous>, transform_indices = @transform_2, window_bounds = array<i64: 1, 256>}, {pipeline_mode = #tpu.pipeline_mode<synchronous>, transform_indices = @transform_3, window_bounds = array<i64: 256, 8>}, {pipeline_mode = #tpu.pipeline_mode<synchronous>, transform_indices = @transform_4, window_bounds = array<i64: 1, 8>}, {pipeline_mode = #tpu.pipeline_mode<synchronous>, transform_indices = @transform_5, window_bounds = array<i64: 2, 4>}, {pipeline_mode = #tpu.pipeline_mode<synchronous>, transform_indices = @transform_6, window_bounds = array<i64: 2, 4>}]} {
    %c0 = arith.constant 0 : index
    %c0_0 = arith.constant 0 : index
    %0 = vector.load %arg1[%c0, %c0_0] : memref<2x8xf32, #tpu.memory_space<vmem>>, vector<2x8xf32>
    %c0_1 = arith.constant 0 : index
    %c0_2 = arith.constant 0 : index
    %1 = vector.load %arg2[%c0_1, %c0_2] : memref<8x256xf32, #tpu.memory_space<vmem>>, vector<8x256xf32>
    %cst = arith.constant dense<0.000000e+00> : vector<2x256xf32>
    %2 = tpu.matmul %0, %1, %cst {dimension_numbers = #tpu.dot_dimension_numbers<[1], [0], [0], [1], [0, 0, 1, 1], [], []>} : vector<2x8xf32>, vector<8x256xf32>, vector<2x256xf32> -> vector<2x256xf32>
    %c0_3 = arith.constant 0 : index
    %c0_4 = arith.constant 0 : index
    %3 = vector.load %arg3[%c0_3, %c0_4] : memref<1x256xf32, #tpu.memory_space<vmem>>, vector<1x256xf32>
    %4 = vector.broadcast %3 : vector<1x256xf32> to vector<2x256xf32>
    %5 = arith.addf %2, %4 : vector<2x256xf32>
    %cst_5 = arith.constant 0.000000e+00 : f32
    %6 = vector.broadcast %cst_5 : f32 to vector<2x256xf32>
    %7 = arith.maximumf %5, %6 : vector<2x256xf32>
    %c0_6 = arith.constant 0 : index
    %c0_7 = arith.constant 0 : index
    %8 = vector.load %arg4[%c0_6, %c0_7] : memref<256x8xf32, #tpu.memory_space<vmem>>, vector<256x8xf32>
    %cst_8 = arith.constant dense<0.000000e+00> : vector<2x8xf32>
    %9 = tpu.matmul %7, %8, %cst_8 {dimension_numbers = #tpu.dot_dimension_numbers<[1], [0], [0], [1], [0, 0, 1, 1], [], []>} : vector<2x256xf32>, vector<256x8xf32>, vector<2x8xf32> -> vector<2x8xf32>
    %c0_9 = arith.constant 0 : index
    %c0_10 = arith.constant 0 : index
    %10 = vector.load %arg5[%c0_9, %c0_10] : memref<1x8xf32, #tpu.memory_space<vmem>>, vector<1x8xf32>
    %11 = vector.broadcast %10 : vector<1x8xf32> to vector<2x8xf32>
    %12 = arith.addf %9, %11 : vector<2x8xf32>
    %13 = vector.extract_strided_slice %12 {offsets = [0, 0], sizes = [2, 4], strides = [1, 1]} : vector<2x8xf32> to vector<2x4xf32>
    %c0_11 = arith.constant 0 : index
    %c0_12 = arith.constant 0 : index
    %14 = vector.load %arg6[%c0_11, %c0_12] : memref<2x4xf32, #tpu.memory_space<vmem>>, vector<2x4xf32>
    tpu.vector_store %arg6[%c0_11, %c0_12], %13 {strides = array<i32>} : memref<2x4xf32, #tpu.memory_space<vmem>>, vector<2x4xf32>,
    %15 = vector.extract_strided_slice %12 {offsets = [0, 4], sizes = [2, 4], strides = [1, 1]} : vector<2x8xf32> to vector<2x4xf32>
    %c0_13 = arith.constant 0 : index
    %c0_14 = arith.constant 0 : index
    %16 = vector.load %arg7[%c0_13, %c0_14] : memref<2x4xf32, #tpu.memory_space<vmem>>, vector<2x4xf32>
    tpu.vector_store %arg7[%c0_13, %c0_14], %15 {strides = array<i32>} : memref<2x4xf32, #tpu.memory_space<vmem>>, vector<2x4xf32>,
    return
  }
  func.func @transform_0(%arg0: i32) -> (i32, i32) {
    %c0_i32 = arith.constant 0 : i32
    %c0_i32_0 = arith.constant 0 : i32
    %c0_i32_1 = arith.constant 0 : i32
    return %c0_i32, %c0_i32_0 : i32, i32
  }
  func.func @transform_1(%arg0: i32) -> (i32, i32) {
    %c0_i32 = arith.constant 0 : i32
    %c0_i32_0 = arith.constant 0 : i32
    %c0_i32_1 = arith.constant 0 : i32
    return %c0_i32, %c0_i32_0 : i32, i32
  }
  func.func @transform_2(%arg0: i32) -> (i32, i32) {
    %c0_i32 = arith.constant 0 : i32
    %c0_i32_0 = arith.constant 0 : i32
    %c0_i32_1 = arith.constant 0 : i32
    return %c0_i32, %c0_i32_0 : i32, i32
  }
  func.func @transform_3(%arg0: i32) -> (i32, i32) {
    %c0_i32 = arith.constant 0 : i32
    %c0_i32_0 = arith.constant 0 : i32
    %c0_i32_1 = arith.constant 0 : i32
    return %c0_i32, %c0_i32_0 : i32, i32
  }
  func.func @transform_4(%arg0: i32) -> (i32, i32) {
    %c0_i32 = arith.constant 0 : i32
    %c0_i32_0 = arith.constant 0 : i32
    %c0_i32_1 = arith.constant 0 : i32
    return %c0_i32, %c0_i32_0 : i32, i32
  }
  func.func @transform_5(%arg0: i32) -> (i32, i32) {
    %c0_i32 = arith.constant 0 : i32
    %c0_i32_0 = arith.constant 0 : i32
    %c0_i32_1 = arith.constant 0 : i32
    return %c0_i32, %c0_i32_0 : i32, i32
  }
  func.func @transform_6(%arg0: i32) -> (i32, i32) {
    %c0_i32 = arith.constant 0 : i32
    %c0_i32_0 = arith.constant 0 : i32
    %c0_i32_1 = arith.constant 0 : i32
    return %c0_i32, %c0_i32_0 : i32, i32
  }
}

</mosaic_0001>

<bundles_post_ra>
// kernel: tpu_custom_call.1
= control target key start
LH: loop header
LB: loop body
LE: loop exit
PB: predicated region body
PF: predicated region fallthrough
CT: control target
= control target key end

     0   :  { %12 = vsyncpa [#allocation3], 0  ;;  %vm39_vm0 = vcmask 64512   ;;  %v381_v3 = vmov 0.0   ;;  %s557_s0 = inlined_call_operand.vmem [shape: f32[2,8], index: 0, kind: input, shape index: {}]   ;;  %s558_s1 = inlined_call_operand.vmem [shape: f32[8,256], index: 1, kind: input, shape index: {}]   ;;  %s559_s2 = inlined_call_operand.vmem [shape: f32[1,256], index: 2, kind: input, shape index: {}]   ;;  %s560_s3 = inlined_call_operand.vmem [shape: f32[256,8], index: 3, kind: input, shape index: {}]   ;;  %s561_s4 = inlined_call_operand.vmem [shape: f32[1,8], index: 4, kind: input, shape index: {}]   ;;  %s562_s5 = inlined_call_operand.hbm [shape: f32[2,4], index: 5, kind: output, shape index: {0}]   ;;  %s563_s6 = inlined_call_operand.hbm [shape: f32[2,4], index: 6, kind: output, shape index: {1}]  }
   0x1   :  { %v26_v0 = vld [vmem:[%s558_s1 + $0x8] sm:$0xff]  ;;  %v25_v1 = vld [vmem:[%s558_s1] sm:$0xff]  ;;  %107 = vmatprep.mubr.f32.mxu0 %v381_v3  ;;  %v134_v9 = vld [vmem:[%s560_s3 + $0x90] sm:$0xff] }
   0x2   :  { %v24_v2 = vld [vmem:[%s557_s0] sm:$0x3]  ;;  %43 = vmatprep.subr.mxu0 %v26_v0  ;;  %v133_v5 = vld [vmem:[%s560_s3 + $0x88] sm:$0xff]  ;;  %v135_v10 = vld [vmem:[%s560_s3 + $0x98] sm:$0xff] }
   0x3   :  { %v132_v4 = vld [vmem:[%s560_s3 + $0x80] sm:$0xff]  ;;  %44 = vmatpush1.msra.mxu0 %v25_v1  ;;  %v117_v8 = vld [vmem:[%s560_s3 + $0x8] sm:$0xff]  ;;  %v301_v12 = vpack.c.bf16 %v135_v10, %v134_v9  ;;  %v118_v13 = vld [vmem:[%s560_s3 + $0x10] sm:$0xff] }
   0x4   :  { %v116_v6 = vld [vmem:[%s560_s3] sm:$0xff]  ;;  %v297_v7 = vpack.c.bf16 %v133_v5, %v132_v4  ;;  %260 = vmatmul.mubr.msk.f32.vlgmr.msra.gmra.mrb[0].mxu0 %vm39_vm0, %v24_v2  ;;  %v119_v14 = vld [vmem:[%s560_s3 + $0x18] sm:$0xff]  ;;  %v137_v16 = vld [vmem:[%s560_s3 + $0xa8] sm:$0xff] }
   0x5   :  { %v299_v11 = vpack.c.bf16 %v117_v8, %v116_v6  ;;  %v136_v15 = vld [vmem:[%s560_s3 + $0xa0] sm:$0xff]  ;;  %v303_v17 = vpack.c.bf16 %v119_v14, %v118_v13  ;;  %v121_v20 = vld [vmem:[%s560_s3 + $0x28] sm:$0xff]  ;;  %v138_v21 = vld [vmem:[%s560_s3 + $0xb0] sm:$0xff] }
   0x6   :  { %298 = vmatprep.subr.bf16.mxu1 %v297_v7  ;;  %v305_v18 = vpack.c.bf16 %v137_v16, %v136_v15  ;;  %v120_v19 = vld [vmem:[%s560_s3 + $0x20] sm:$0xff]  ;;  %v139_v22 = vld [vmem:[%s560_s3 + $0xb8] sm:$0xff]  ;;  %v122_v25 = vld [vmem:[%s560_s3 + $0x30] sm:$0xff] }
   0x7   :  { %300 = vmatpush3.bf16.msra.mxu1 %v299_v11  ;;  %v307_v23 = vpack.c.bf16 %v121_v20, %v120_v19  ;;  %v309_v24 = vpack.c.bf16 %v139_v22, %v138_v21  ;;  %v123_v26 = vld [vmem:[%s560_s3 + $0x38] sm:$0xff] }
   0x8   :  { %302 = vmatprep.subr.bf16.mxu1 %v301_v12 }
   0xb   :  { %304 = vmatpush3.bf16.msra.mxu1 %v303_v17 }
   0xc   :  { %306 = vmatprep.subr.bf16.mxu1 %v305_v18 }
   0xd   :  { %13 = vsyncpa [#allocation5], 0  ;;  %v140_v27 = vld [vmem:[%s560_s3 + $0xc0] sm:$0xff]  ;;  %v141_v28 = vld [vmem:[%s560_s3 + $0xc8] sm:$0xff]  ;;  %v311_v29 = vpack.c.bf16 %v123_v26, %v122_v25  ;;  %v29_v52 = vlaneseq  ;;  %s382_s16 = smov [#allocation2]   ;;  %vm225_vm1 = vcmask 25600  }
   0xe   :  { %v313_v30 = vpack.c.bf16 %v141_v28, %v140_v27  ;;  %v124_v31 = vld [vmem:[%s560_s3 + $0x40] sm:$0xff]  ;;  %v125_v32 = vld [vmem:[%s560_s3 + $0x48] sm:$0xff]  ;;  %v142_v33 = vld [vmem:[%s560_s3 + $0xd0] sm:$0xff]  ;;  %s238_s17 = sshll.u32 %s382_s16, 4  ;;  %s239_s17 = int_to_ptr.vmem [resolvable:$true] %s238_s17 }
   0xf   :  { %308 = vmatpush3.bf16.msra.mxu1 %v307_v23  ;;  %v143_v34 = vld [vmem:[%s560_s3 + $0xd8] sm:$0xff]  ;;  %v315_v35 = vpack.c.bf16 %v125_v32, %v124_v31  ;;  %v126_v37 = vld [vmem:[%s560_s3 + $0x50] sm:$0xff]  ;;  %v144_v39 = vld [vmem:[%s560_s3 + $0xe0] sm:$0xff]  ;;  %v30_v53 = vshrl.u32 %v29_v52, 7  ;;  %s333_s18 = scalar_lea.vmem %s239_s17, 32  ;;  %p338_p1 = scmp.lt.s32.totalorder %s239_s17, %s239_s17 }
  0x10   :  { %310 = vmatprep.subr.bf16.mxu1 %v309_v24  ;;  %v317_v36 = vpack.c.bf16 %v143_v34, %v142_v33  ;;  %v127_v38 = vld [vmem:[%s560_s3 + $0x58] sm:$0xff]  ;;  %v145_v40 = vld [vmem:[%s560_s3 + $0xe8] sm:$0xff]  ;;  %v128_v43 = vld [vmem:[%s560_s3 + $0x60] sm:$0xff]  ;;  %p334_p0 = scmp.ne.s32.totalorder %s239_s17, %s333_s18  ;;  %p339_p2 = scmp.lt.s32.totalorder %s333_s18, %s333_s18 }
  0x11   :  { %v319_v41 = vpack.c.bf16 %v127_v38, %v126_v37  ;;  %v321_v42 = vpack.c.bf16 %v145_v40, %v144_v39  ;;  %v129_v44 = vld [vmem:[%s560_s3 + $0x68] sm:$0xff]  ;;  %v146_v46 = vld [vmem:[%s560_s3 + $0xf0] sm:$0xff]  ;;  %v147_v47 = vld [vmem:[%s560_s3 + $0xf8] sm:$0xff]  ;;  %v31_v54 = vsub.s32 0, %v30_v53  ;;  %v35_v56 = vsub.s32 1, %v30_v53 }
  0x12   :  { %v323_v45 = vpack.c.bf16 %v129_v44, %v128_v43  ;;  %v325_v48 = vpack.c.bf16 %v147_v47, %v146_v46  ;;  %v130_v49 = vld [vmem:[%s560_s3 + $0x70] sm:$0xff]  ;;  %v131_v50 = vld [vmem:[%s560_s3 + $0x78] sm:$0xff]  ;;  %v27_v55 = vld [vmem:[%s559_s2] sm:$0x3]  ;;  %s383_s2 = smov 124   ;;  %p340_p3 = por %p339_p2, %p338_p1 }
  0x13   :  { %312 = vmatpush3.bf16.msra.mxu1 %v311_v29  ;;  %v327_v51 = vpack.c.bf16 %v131_v50, %v130_v49  ;;  %v32_v57 = vrot.slane %v27_v55, %v31_v54  ;;  %v36_v58 = vrot.slane %v27_v55, %v35_v56  ;;  %v261_v3 = vld [vmem:[%s561_s4] ss:$0 sm:$0xff] }
  0x14   :  { %314 = vmatprep.subr.bf16.mxu1 %v313_v30  ;;  %p341_p4 = pnand %p340_p3, %p334_p0 }
  0x17   :  { %316 = vmatpush3.bf16.msra.mxu1 %v315_v35 }
  0x18   :  { %318 = vmatprep.subr.bf16.mxu1 %v317_v36 }
  0x1b   :  { %320 = vmatpush3.bf16.msra.mxu1 %v319_v41 }
  0x1c   :  { %322 = vmatprep.subr.bf16.mxu1 %v321_v42 }
  0x1f   :  { %324 = vmatpush3.bf16.msra.mxu1 %v323_v45 }
  0x20   :  { %326 = vmatprep.subr.bf16.mxu1 %v325_v48 }
  0x23   :  { %328 = vmatpush3.bf16.msra.mxu1 %v327_v51 }
  0xd7   :  { %v109_v59 = vpop.f32.mrb[0].mxu0 }
  0xd8   :  { %v110_v60 = vadd.f32 %v109_v59, %v32_v57  ;;  %v111_v61 = vpop.f32.mrb[1].mxu0 }
  0xd9   :  { %v112_v62 = vadd.f32 %v111_v61, %v36_v58 }
  0xda   :  { %v114_v0 = vmax.f32 %v110_v60, 0.0 }
  0xdb   :  { %v115_v63 = vmax.f32 %v112_v62, 0.0 }
  0xdd   :  { %219 = vmatprep.mubr.f32.mxu1 %v115_v63 }
  0xde   :  { %220 = vmatmul.mubr.f32.vlgmr.msra.gmra.mrb[0].mxu1 %v114_v0 }
 0x1b1   :  { %v294_v1 = vpop.f32.mrb[0].mxu1 }
 0x1b2   :  { %v295_v2 = vpop.f32.mrb[1].mxu1 }
 0x1b3   :  { %v296_v4 = vadd.f32 %v295_v2, %v294_v1 }
 0x1b5   :  { %v222_v5 = vadd.f32 %v296_v4, %v261_v3 }
 0x1b7   :  { %228 = vrot.lane.b32.xlu0 %v222_v5, %s383_s2  ;;  %226 = vst.msk [vmem:[#allocation2] sm:$0x3] %vm225_vm1, %v222_v5 }
 0x1b8   :  { %344 = shalt.err (!%p341_p4)
}
 0x1b9   :  { %s345_s4 = scalar_lea.hbm %s562_s5, 32 }
 0x1ba   :  { %p346_p5 = scmp.ne.s32.totalorder %s562_s5, %s345_s4  ;;  %p349_p6 = scmp.lt.u32.totalorder %s345_s4, %s562_s5 }
 0x1bc   :  { %p351_p7 = pnand %p349_p6, %p346_p5 }
 0x1be   :  { %354 = shalt.err (!%p351_p7)
}
 0x1bf   :  { %241 = dma.vmem_to_hbm [thread:$0]  %s239_s17, 32, %s562_s5, [#allocation3]  }
 0x1c0   :  { %s384_s27 = smov [#allocation4]  }
 0x1c1   :  { %s248_s28 = sshll.u32 %s384_s27, 4  ;;  %s249_s28 = int_to_ptr.vmem [resolvable:$true] %s248_s28 }
 0x1c2   :  { %s355_s29 = scalar_lea.vmem %s249_s28, 32  ;;  %p360_p9 = scmp.lt.s32.totalorder %s249_s28, %s249_s28 }
 0x1c3   :  { %p356_p8 = scmp.ne.s32.totalorder %s249_s28, %s355_s29  ;;  %p361_p10 = scmp.lt.s32.totalorder %s355_s29, %s355_s29 }
 0x1c5   :  { %p362_p11 = por %p361_p10, %p360_p9 }
 0x1c7   :  { %p363_p12 = pnand %p362_p11, %p356_p8 }
 0x229   :  { %v229_v6 = vpop.permute.xlu0 %228 }
 0x22a   :  { %231 = vst.msk [vmem:[#allocation4] sm:$0x3] %vm225_vm1, %v229_v6 }
 0x22b   :  { %366 = shalt.err (!%p363_p12)
}
 0x22c   :  { %s367_s8 = scalar_lea.hbm %s563_s6, 32 }
 0x22d   :  { %p368_p13 = scmp.ne.s32.totalorder %s563_s6, %s367_s8  ;;  %p371_p0 = scmp.lt.u32.totalorder %s367_s8, %s563_s6 }
 0x22f   :  { %p373_p1 = pnand %p371_p0, %p368_p13 }
 0x231   :  { %376 = shalt.err (!%p373_p1)
}
 0x232   :  { %251 = dma.vmem_to_hbm [thread:$0]  %s249_s28, 32, %s563_s6, [#allocation5]  }
 0x233   :  { %377 = dma.done.wait [#allocation3], 32  }
 0x234   :  { %378 = vsyncadd [#allocation3], 4294967264 }
 0x235   :  { %379 = dma.done.wait [#allocation5], 32  }
 0x236   :  { %380 = vsyncadd [#allocation5], 4294967264 }
 0x237   :  { %258 = vsyncpa [#allocation3], 1 }
 0x238   :  { %259 = vsyncpa [#allocation5], 1 }

</bundles_post_ra>
